<compile_context>
chip_gen: v7x
topology: tpu7x:2x2x1
jax: 0.10.0
libtpu: 0.0.40
codegen_flags: <defaults>
</compile_context>

<pallas_src>
import functools

import jax
import jax.numpy as jnp
from jax.experimental import pallas as pl
from jax.experimental.pallas import tpu as pltpu


def _batchstd_tiled_kernel(x_ref, o_ref, acc_ref, *, inv_b1, inv_chw):
    """One grid step = one lane tile of the flattened (b, c*h*w) input.

    Steps 0 .. n-2 : passthrough copy + accumulate per-lane unbiased std.
    Step  n-1      : broadcast the mean-std scalar into the extra-channel slab.
    """
    i = pl.program_id(0)
    n = pl.num_programs(0)

    @pl.when(i == 0)
    def _init():
        acc_ref[...] = jnp.zeros_like(acc_ref)

    @pl.when(i < n - 1)
    def _passthrough_and_accumulate():
        x = x_ref[...]                                      # (b, TL), input dtype
        o_ref[...] = x                                      # lane-dense store, no upcast
        xf = x.astype(jnp.float32)                          # upcast only on reduce path
        mean = jnp.mean(xf, axis=0, keepdims=True)                       # (1, TL)
        var = jnp.sum((xf - mean) ** 2, axis=0, keepdims=True) * inv_b1  # (1, TL)
        acc_ref[...] += jnp.sqrt(var)                       # running per-lane std sum

    @pl.when(i == n - 1)
    def _finalize():
        # Single cross-lane reduce over the accumulated std sums -> scalar mean.
        s = jnp.sum(acc_ref[...], keepdims=True) * inv_chw  # (1, 1)
        o_ref[...] = jnp.broadcast_to(s, o_ref.shape).astype(o_ref.dtype)


def _batchstd_scalar_kernel(x_ref, s_ref, *, inv_b1, inv_chw):
    """Fallback: whole array in one block -> scalar mean of per-element std."""
    xf = x_ref[...].astype(jnp.float32)                     # (b, c*h*w)
    mean = jnp.mean(xf, axis=0, keepdims=True)
    var = jnp.sum((xf - mean) ** 2, axis=0, keepdims=True) * inv_b1
    s_ref[...] = jnp.sum(jnp.sqrt(var), keepdims=True) * inv_chw


def batch_std(x):
    """Pallas implementation of BatchStd.forward for NCHW input x."""
    b, c, h, w = x.shape
    hw = h * w
    c_hw = c * hw
    out_w = c_hw + hw

    # torch.std with ddof=1 and a single sample is NaN; mirror that.
    inv_b1 = (1.0 / (b - 1)) if b > 1 else float("nan")
    inv_chw = 1.0 / c_hw
    x2 = x.reshape(b, c_hw)

    if hw % 128 == 0:
        # Fast path: lane-tiled, pipelined, single pass over HBM.
        # Tile = m whole channels (m | c), 128-lane aligned; ~2 MiB per tile cap
        # keeps 2-in + 2-out double buffers inside default scoped VMEM everywhere.
        bytes_per_lane = b * x.dtype.itemsize
        budget_lanes = (2 * 1024 * 1024) // max(1, bytes_per_lane)
        max_tl = max(hw, min(32768, budget_lanes))
        m = 1
        for cand in range(1, c + 1):
            if c % cand == 0 and cand * hw <= max_tl:
                m = cand
        tl = m * hw
        n_in = c // m                    # number of passthrough tiles
        grid = (n_in + 1,)               # +1 final step writes the extra channel

        kernel = functools.partial(
            _batchstd_tiled_kernel, inv_b1=inv_b1, inv_chw=inv_chw)

        out2 = pl.pallas_call(
            kernel,
            out_shape=jax.ShapeDtypeStruct((b, out_w), x.dtype),
            grid_spec=pltpu.PrefetchScalarGridSpec(
                num_scalar_prefetch=0,
                grid=grid,
                in_specs=[pl.BlockSpec(
                    (b, tl),
                    # Finalize step revisits the previous tile's block index so
                    # its input DMA is skipped by the pipeline (and never OOB).
                    lambda i: (0, jnp.minimum(i, n_in - 1)))],
                out_specs=pl.BlockSpec((b, tl), lambda i: (0, i)),
                scratch_shapes=[pltpu.VMEM((1, tl), jnp.float32)],
            ),
            compiler_params=pltpu.CompilerParams(
                # std accumulator is carried across tiles -> reduction axis.
                dimension_semantics=("arbitrary",)),
        )(x2)
        return out2.reshape(b, c + 1, h, w)

    # Fallback for spatial sizes where h*w is not a multiple of 128: the Pallas
    # kernel computes only the scalar (whole array as one block, always layout
    # legal); the broadcast + channel concat is left to XLA.
    # TODO(synk): lane-tiled streaming for unaligned h*w (needs masked partial tiles).
    kernel = functools.partial(
        _batchstd_scalar_kernel, inv_b1=inv_b1, inv_chw=inv_chw)
    s = pl.pallas_call(
        kernel,
        out_shape=jax.ShapeDtypeStruct((1, 1), jnp.float32),
        grid=(1,),
        in_specs=[pl.BlockSpec((b, c_hw), lambda i: (0, 0))],
        out_specs=pl.BlockSpec((1, 1), lambda i: (0, 0)),
    )(x2)
    extra = jnp.broadcast_to(s[0, 0].astype(x.dtype), (b, 1, h, w))
    return jnp.concatenate([x, extra], axis=1)


def batch_std_ref(x):
    """Pure-JAX reference mirroring the PyTorch module."""
    b, c, h, w = x.shape
    s = jnp.std(x, axis=0, ddof=1).mean()
    extra = jnp.full((b, 1, h, w), s, dtype=x.dtype)
    return jnp.concatenate([x, extra], axis=1)


if __name__ == "__main__":
    key = jax.random.PRNGKey(0)

    # Primary shape (matches the module's implied sizes): fast path, 1 tile + finalize.
    b, c, h, w = 2, 4, 16, 16
    x = jax.random.normal(key, (b, c, h, w), dtype=jnp.float32)
    out = jax.block_until_ready(batch_std(x))
    ref = batch_std_ref(x)
    assert out.shape == (b, c + 1, h, w), out.shape
    assert jnp.allclose(out, ref, atol=1e-4, rtol=1e-4), "mismatch vs reference (shape 1)"

    # Larger aligned shape that exercises multi-tile streaming accumulation
    # (several passthrough tiles + clipped final extra-channel block).
    b2, c2, h2, w2 = 4, 96, 32, 32
    x2 = jax.random.normal(jax.random.PRNGKey(0), (b2, c2, h2, w2), dtype=jnp.float32)
    out2 = jax.block_until_ready(batch_std(x2))
    ref2 = batch_std_ref(x2)
    assert out2.shape == (b2, c2 + 1, h2, w2), out2.shape
    assert jnp.allclose(out2, ref2, atol=1e-4, rtol=1e-4), "mismatch vs reference (shape 2)"

    # Unaligned spatial size exercises the scalar-kernel fallback path.
    b3, c3, h3, w3 = 2, 3, 5, 7
    x3 = jax.random.normal(jax.random.PRNGKey(0), (b3, c3, h3, w3), dtype=jnp.float32)
    out3 = jax.block_until_ready(batch_std(x3))
    ref3 = batch_std_ref(x3)
    assert out3.shape == (b3, c3 + 1, h3, w3), out3.shape
    assert jnp.allclose(out3, ref3, atol=1e-4, rtol=1e-4), "mismatch vs reference (shape 3)"

    print("KERNEL_OK")
</pallas_src>

<mosaic_0001>
module attributes {stable_mosaic.version = 11 : i64} {
  func.func @_batchstd_tiled_kernel(%arg0: i32, %arg1: memref<2x1024xf32, #tpu.memory_space<vmem>>, %arg2: memref<2x1024xf32, #tpu.memory_space<vmem>>, %arg3: memref<1x1024xf32, #tpu.memory_space<vmem>>) attributes {dimension_semantics = [#tpu.dimension_semantics<arbitrary>], iteration_bounds = array<i64: 2>, scalar_prefetch = 0 : i64, scratch_operands = 1 : i64, tpu.core_type = #tpu.core_type<tc>, window_params = [{transform_indices = @transform_0, window_bounds = array<i64: 2, 1024>}, {transform_indices = @transform_1, window_bounds = array<i64: 2, 1024>}]} {
    %c0_i32 = arith.constant 0 : i32
    %0 = arith.cmpi eq, %arg0, %c0_i32 : i32
    %1 = arith.extui %0 : i1 to i32
    %c0_i32_0 = arith.constant 0 : i32
    %2 = arith.cmpi ne, %1, %c0_i32_0 : i32
    scf.if %2 {
      %cst = arith.constant 0.000000e+00 : f32
      %9 = vector.broadcast %cst : f32 to vector<1x1024xf32>
      %c0 = arith.constant 0 : index
      %c0_4 = arith.constant 0 : index
      %10 = vector.load %arg3[%c0, %c0_4] : memref<1x1024xf32, #tpu.memory_space<vmem>>, vector<1x1024xf32>
      tpu.vector_store %arg3[%c0, %c0_4], %9 {strides = array<i32>} : memref<1x1024xf32, #tpu.memory_space<vmem>>, vector<1x1024xf32>,
    } else {
    }
    %c1_i32 = arith.constant 1 : i32
    %3 = arith.cmpi slt, %arg0, %c1_i32 : i32
    %4 = arith.extui %3 : i1 to i32
    %c0_i32_1 = arith.constant 0 : i32
    %5 = arith.cmpi ne, %4, %c0_i32_1 : i32
    scf.if %5 {
      %c0 = arith.constant 0 : index
      %c0_4 = arith.constant 0 : index
      %9 = vector.load %arg1[%c0, %c0_4] : memref<2x1024xf32, #tpu.memory_space<vmem>>, vector<2x1024xf32>
      %c0_5 = arith.constant 0 : index
      %c0_6 = arith.constant 0 : index
      %10 = vector.load %arg2[%c0_5, %c0_6] : memref<2x1024xf32, #tpu.memory_space<vmem>>, vector<2x1024xf32>
      tpu.vector_store %arg2[%c0_5, %c0_6], %9 {strides = array<i32>} : memref<2x1024xf32, #tpu.memory_space<vmem>>, vector<2x1024xf32>,
      %cst = arith.constant dense<0.000000e+00> : vector<1024xf32>
      %11 = vector.multi_reduction <add>, %9, %cst [0] : vector<2x1024xf32> to vector<1024xf32>
      %12 = vector.shape_cast %11 : vector<1024xf32> to vector<1x1024xf32>
      %cst_7 = arith.constant 2.000000e+00 : f32
      %13 = vector.broadcast %cst_7 : f32 to vector<1x1024xf32>
      %14 = arith.divf %12, %13 : vector<1x1024xf32>
      %15 = vector.broadcast %14 : vector<1x1024xf32> to vector<2x1024xf32>
      %16 = arith.subf %9, %15 : vector<2x1024xf32>
      %17 = arith.mulf %16, %16 : vector<2x1024xf32>
      %cst_8 = arith.constant dense<0.000000e+00> : vector<1024xf32>
      %18 = vector.multi_reduction <add>, %17, %cst_8 [0] : vector<2x1024xf32> to vector<1024xf32>
      %19 = vector.shape_cast %18 : vector<1024xf32> to vector<1x1024xf32>
      %cst_9 = arith.constant 1.000000e+00 : f32
      %20 = vector.broadcast %cst_9 : f32 to vector<1x1024xf32>
      %21 = arith.mulf %19, %20 : vector<1x1024xf32>
      %c0_10 = arith.constant 0 : index
      %c0_11 = arith.constant 0 : index
      %22 = vector.load %arg3[%c0_10, %c0_11] : memref<1x1024xf32, #tpu.memory_space<vmem>>, vector<1x1024xf32>
      %23 = math.sqrt %21 : vector<1x1024xf32>
      %24 = arith.addf %22, %23 : vector<1x1024xf32>
      %c0_12 = arith.constant 0 : index
      %c0_13 = arith.constant 0 : index
      %25 = vector.load %arg3[%c0_12, %c0_13] : memref<1x1024xf32, #tpu.memory_space<vmem>>, vector<1x1024xf32>
      tpu.vector_store %arg3[%c0_12, %c0_13], %24 {strides = array<i32>} : memref<1x1024xf32, #tpu.memory_space<vmem>>, vector<1x1024xf32>,
    } else {
    }
    %c1_i32_2 = arith.constant 1 : i32
    %6 = arith.cmpi eq, %arg0, %c1_i32_2 : i32
    %7 = arith.extui %6 : i1 to i32
    %c0_i32_3 = arith.constant 0 : i32
    %8 = arith.cmpi ne, %7, %c0_i32_3 : i32
    scf.if %8 {
      %c0 = arith.constant 0 : index
      %c0_4 = arith.constant 0 : index
      %9 = vector.load %arg3[%c0, %c0_4] : memref<1x1024xf32, #tpu.memory_space<vmem>>, vector<1x1024xf32>
      %10 = vector.shape_cast %9 : vector<1x1024xf32> to vector<1x1x1024xf32>
      %cst = arith.constant dense<0.000000e+00> : vector<1xf32>
      %11 = vector.multi_reduction <add>, %10, %cst [1, 2] : vector<1x1x1024xf32> to vector<1xf32>
      %12 = vector.shape_cast %11 : vector<1xf32> to vector<1x1x1xf32>
      %13 = vector.extract %12[0, 0, 0] : f32 from vector<1x1x1xf32>
      %14 = vector.broadcast %13 : f32 to vector<1x1xf32>
      %cst_5 = arith.constant 9.765625E-4 : f32
      %15 = vector.broadcast %cst_5 : f32 to vector<1x1xf32>
      %16 = arith.mulf %14, %15 : vector<1x1xf32>
      %17 = vector.shape_cast %16 : vector<1x1xf32> to vector<1x1xf32>
      %18 = vector.broadcast %17 : vector<1x1xf32> to vector<2x1024xf32>
      %c0_6 = arith.constant 0 : index
      %c0_7 = arith.constant 0 : index
      %19 = vector.load %arg2[%c0_6, %c0_7] : memref<2x1024xf32, #tpu.memory_space<vmem>>, vector<2x1024xf32>
      tpu.vector_store %arg2[%c0_6, %c0_7], %18 {strides = array<i32>} : memref<2x1024xf32, #tpu.memory_space<vmem>>, vector<2x1024xf32>,
    } else {
    }
    return
  }
  func.func @transform_0(%arg0: i32) -> (i32, i32) {
    %c0_i32 = arith.constant 0 : i32
    %0 = arith.minsi %arg0, %c0_i32 : i32
    %c0_i32_0 = arith.constant 0 : i32
    %c0_i32_1 = arith.constant 0 : i32
    return %c0_i32_0, %0 : i32, i32
  }
  func.func @transform_1(%arg0: i32) -> (i32, i32) {
    %c0_i32 = arith.constant 0 : i32
    %c0_i32_0 = arith.constant 0 : i32
    return %c0_i32, %arg0 : i32, i32
  }
}

</mosaic_0001>

<bundles_post_ra>
// kernel: tpu_custom_call.1
= control target key start
LH: loop header
LB: loop body
LE: loop exit
PB: predicated region body
PF: predicated region fallthrough
CT: control target
= control target key end

     0   :  { %6 = vsyncpa [#allocation4], 0  ;;  %s1301_s0 = inlined_call_operand.hbm [shape: f32[2,1024], index: 0, kind: input, shape index: {}]   ;;  %s1302_s1 = inlined_call_operand.hbm [shape: f32[2,1280], index: 1, kind: output, shape index: {}]  }
   0x1   :  { %8 = vsyncpa [#allocation4 + $0x1], 0 }
   0x2   :  { %9 = vsyncpa [#allocation5], 0 }
   0x3   :  { %11 = vsyncpa [#allocation5 + $0x1], 0  ;;  %s953_s6 = smov 0   ;;  %s955_s7 = smov 0  }
   0x4   :  { %s957_s8 = smov 0   ;;  %s959_s9 = smov 0  }
   0x5   :  { %s961_s10 = smov 0   ;;  %s963_s11 = smov 0  }
   0x6   :  { %s965_s12 = smov 0  }
   0x7 LB: > { %s987_s13 = sadd.s32 4294967295, %s936_s12   ;;  %s701_s14 = sadd.s32 4294967294, %s936_s12   ;;  %s936_s12 = sphi %s965_s12, %s1319_s12   ;;  %s932_s11 = sphi %s963_s11, %s1318_s11   ;;  %s928_s10 = sphi %s961_s10, %s1317_s10   ;;  %s924_s9 = sphi %s959_s9, %s1316_s9   ;;  %s920_s8 = sphi %s957_s8, %s1315_s8   ;;  %s916_s7 = sphi %s955_s7, %s1314_s7   ;;  %s912_s6 = sphi %s953_s6, %s1313_s6  }
   0x8   : > { %s991_s15 = sadd.s32 1, %s936_s12   ;;  %p21_p0 = scmp.lt.s32.totalorder %s936_s12, 0 }
   0x9   : > { %p23_p1 = scmp.lt.s32.totalorder %s991_s15, 0  ;;  %s28_s16 = sadd.s32 1, %s932_s11 }
   0xa   : > { %s22_s17 = scalar_select %p21_p0, %s936_s12, 0 }
   0xb   : > { %s24_s18 = scalar_select %p23_p1, %s991_s15, 0 }
   0xc   : > { %p35_p2 = scmp.ne.s32.totalorder %s932_s11, %s928_s10  ;;  %p36_p3 = scmp.eq.s32.totalorder %s936_s12, 0 }
   0xd   : > { %s25_s19 = ssub.s32 %s22_s17, %s24_s18  ;;  %p41_p4 = scmp.ne.s32.totalorder %s928_s10, %s924_s9 }
   0xe   : > { %p26_p5 = scmp.eq.s32.totalorder %s25_s19, 0  ;;  %p1002_p6 = por %p36_p3, %p35_p2 }
   0xf   : > { %p42_p7 = scmp.eq.s32.totalorder %s987_s13, 0  ;;  %s51_s21 = ssub.s32 %s936_s12, %s991_s15 }
  0x10   : > { %s1010_s22 = scalar_select %p26_p5, %s932_s11, %s28_s16  }
  0x11   : > { %p1012_p8 = por %p42_p7, %p41_p4  ;;  %p52_p9 = scmp.eq.s32.totalorder %s51_s21, 0 }
  0x12   : > { %s54_s24 = sadd.s32 1, %s920_s8  ;;  %p64_p10 = scmp.ne.s32.totalorder %s920_s8, %s916_s7 }
  0x13   : > { %s1020_s25 = scalar_select %p52_p9, %s920_s8, %s54_s24  }
  0x14   : > { %p65_p11 = scmp.eq.s32.totalorder %s987_s13, 1  ;;  %p70_p12 = scmp.ne.s32.totalorder %s916_s7, %s912_s6 }
  0x15   : > { %p71_p13 = scmp.eq.s32.totalorder %s701_s14, 1  ;;  %p737_p2 = scmp.lt.s32.totalorder %s936_s12, 2 }
  0x16   : > { %p1026_p1 = por %p65_p11, %p64_p10  ;;  %s91_s28 = sand.u32 1, %s932_s11  }
  0x17   : > { %p1031_p3 = por %p71_p13, %p70_p12  ;;  %s704_s29 = sshll.u32 %s91_s28, 4 }
  0x18   : > { %s1305_s26 = scalar_select %p1026_p1, 1, 0 }
  0x19   : > { %s1306_s27 = scalar_select %p1031_p3, 1, 0 }
  0x1a   : > { %s722_s30 = sshll.u32 %s22_s17, 8  ;;  %s95_s5 = scalar_lea.vmem [#allocation3], %s704_s29 }
  0x1b   : > { %s1039_s4 = scalar_lea.hbm %s1301_s0, %s722_s30  ;;  %s105_s9 = sshll.u32 %s95_s5, 4  ;;  %s1041_s9 = int_to_ptr.vmem [resolvable:$true] %s105_s9 }
  0x1c   : > { %p1045_p4 = pnand %p737_p2, %p1002_p6  ;;  %s92_s16 = scalar_lea.sflag [#allocation4], %s91_s28 }
  0x1d   : > { %s816_s17 = scalar_lea.hbm %s1039_s4, 256  ;;  %s821_s20 = scalar_lea.hbm %s1301_s0, 256 }
  0x1e   : > { %p817_p9 = scmp.ne.s32.totalorder %s1039_s4, %s816_s17  ;;  %p818_p10 = pneg %p1045_p4 }
  0x1f   : > { %p822_p6 = scmp.lt.u32.totalorder %s1039_s4, %s1301_s0  ;;  %p823_p13 = scmp.lt.u32.totalorder %s821_s20, %s816_s17 }
  0x20   : > { %p819_p11 = pnand %p818_p10, %p817_p9  ;;  %p825_p0 = scmp.lt.u32.totalorder %s816_s17, %s1039_s4 }
  0x21   : > { %p824_p2 = por %p823_p13, %p822_p6 }
  0x22   : > { %p820_p12 = pneg %p819_p11 }
  0x23   : > { %p826_p5 = por %p825_p0, %p824_p2 }
  0x25   : > { %p827_p7 = pnand %p826_p5, %p820_p12 }
  0x27   : > { %830 = shalt.err (!%p827_p7)
}
  0x28   : > { %s831_s28 = scalar_lea.vmem %s1041_s9, 256  ;;  %s938_s29 = smov [#allocation3]  }
  0x29   : > { %p832_p9 = scmp.ne.s32.totalorder %s1041_s9, %s831_s28  ;;  %s836_s30 = sshll.u32 %s938_s29, 4  ;;  %s837_s30 = int_to_ptr.vmem [resolvable:$false] %s836_s30 }
  0x2a   : > { %s838_s2 = scalar_lea.vmem %s837_s30, 512  ;;  %p839_p1 = scmp.lt.s32.totalorder %s1041_s9, %s837_s30 }
  0x2b   : > { %p834_p11 = pnand %p832_p9, %p818_p10  ;;  %p840_p6 = scmp.lt.s32.totalorder %s838_s2, %s831_s28 }
  0x2d   : > { %p835_p3 = pneg %p834_p11  ;;  %p841_p13 = por %p840_p6, %p839_p1 }
  0x2f   : > { %p842_p0 = pnand %p841_p13, %p835_p3 }
  0x31   : > { %845 = shalt.err (!%p842_p0)
}
  0x32   : > { %732 = dma.hbm_to_vmem [thread:$0]  (!%p1045_p4), %s1039_s4, 256, %s1041_s9, %s92_s16  }
  0x33   : > { %p1308_p5 = scmp.lt.s32.totalorder %s936_s12, 3  ;;  %p1309_p7 = scmp.ge.s32.totalorder %s936_s12, 1 }
  0x35   : > { %p111_p10 = pnand %p1309_p7, %p1308_p5 }
  0x36   : > { %s116_s3 = sand.u32 (!%p111_p10), 1, %s928_s10  }
  0x37   : > { %114 = sbr.rel (%p111_p10) target bundleno = 430 (0x1ae), region = 24  ;;  %s708_s5 = sshll.u32 (!%p111_p10), %s116_s3, 4 }
  0x38   : > { %s117_s17 = scalar_lea.sflag (!%p111_p10), [#allocation4], %s116_s3  ;;  %s120_s18 = scalar_lea.vmem (!%p111_p10), [#allocation3], %s708_s5 }
  0x3e   : > { %903 = dma.done.wait (%p1012_p8), %s117_s17, 256  }
  0x3f   : > { %905 = vsyncadd (%p1012_p8), %s117_s17, 4294967040  ;;  %s136_s14 = sand.u32 1, %s916_s7   ;;  %p710_p1 = scmp.ne.s32.totalorder %s987_s13, 0 }
  0x40   : > { %s709_s4 = sshll.u32 %s136_s14, 4  ;;  %v939_v0 = vmov (!%p710_p1), 0.0  }
  0x41   : > { %s1088_s9 = scalar_lea.vmem [#allocation6], %s709_s4  ;;  %150 = sbr.rel (%p710_p1) target bundleno = 72 (0x48), region = 32  ;;  %151 = vst [vmem:[#allocation2] sm:$0xff] (!%p710_p1), %v939_v0 }
  0x48 PF: > { %p711_p3 = scmp.ge.s32.totalorder %s987_s13, 1 }
  0x49   : > { %v1092_v1 = vld [vmem:[%s120_s18] sm:$0xff] (!%p711_p3)  ;;  %v1094_v2 = vld [vmem:[%s120_s18 + $0x8] sm:$0xff] (!%p711_p3)  ;;  %v166_v3 = vlaneseq (!%p711_p3)  ;;  %v940_v4 = vmov (!%p711_p3), 1983009808   ;;  %vm204_vm0 = vcmask (!%p711_p3), 1041408  }
  0x4a   : > { %155 = sbr.rel (%p711_p3) target bundleno = 162 (0xa2), region = 36  ;;  %158 = vst [vmem:[%s1088_s9] sm:$0xff] (!%p711_p3), %v1092_v1  ;;  %159 = vst [vmem:[%s1088_s9 + $0x8] sm:$0xff] (!%p711_p3), %v1094_v2  ;;  %v164_v5 = vunpack.c.l.s4 (!%p711_p3), %v940_v4  ;;  %v162_v7 = vcombine.high (!%p711_p3), %v1092_v1, %v1092_v1  ;;  %v179_v9 = vcombine.high (!%p711_p3), %v1094_v2, %v1094_v2 }
  0x4b   : > { %v1100_v6 = vshrl.u32 (!%p711_p3), %v166_v3, 7 }
  0x4c   : > { %v165_v8 = vunpack.c.0.s8 (!%p711_p3), %v164_v5 }
  0x4e   : > { %v1107_v10 = vsub.s32 (!%p711_p3), %v165_v8, %v1100_v6 }
  0x50   : > { %v169_v11 = vrot.slane (!%p711_p3), %v1092_v1, %v1107_v10  ;;  %v176_v12 = vrot.slane (!%p711_p3), %v162_v7, %v1107_v10  ;;  %v186_v13 = vrot.slane (!%p711_p3), %v1094_v2, %v1107_v10  ;;  %v193_v14 = vrot.slane (!%p711_p3), %v179_v9, %v1107_v10 }
  0x52   : > { %v177_v15 = vcombine.high %v169_v11, %v169_v11  ;;  %v178_v16 = vcombine.high %v176_v12, %v176_v12  ;;  %v194_v17 = vcombine.high %v186_v13, %v186_v13  ;;  %v195_v18 = vcombine.high %v193_v14, %v193_v14 }
  0x53   : > { %v205_v19 = vsel %vm204_vm0, %v169_v11, 0.0  ;;  %v219_v20 = vsel %vm204_vm0, %v176_v12, 0.0  ;;  %v233_v21 = vsel %vm204_vm0, %v186_v13, 0.0  ;;  %v247_v22 = vsel %vm204_vm0, %v193_v14, 0.0 }
  0x54   : > { %v206_v23 = vrot.slane %v205_v19, 4  ;;  %v212_v24 = vsel %vm204_vm0, %v177_v15, 0.0  ;;  %v220_v25 = vrot.slane %v219_v20, 4  ;;  %v226_v26 = vsel %vm204_vm0, %v178_v16, 0.0 }
  0x55   : > { %v213_v27 = vrot.slane %v212_v24, 4  ;;  %v227_v28 = vrot.slane %v226_v26, 4  ;;  %v234_v29 = vrot.slane %v233_v21, 4  ;;  %v240_v30 = vsel %vm204_vm0, %v194_v17, 0.0 }
  0x56   : > { %v207_v31 = vadd.f32 %v206_v23, %v205_v19  ;;  %v221_v32 = vadd.f32 %v220_v25, %v219_v20  ;;  %v241_v33 = vrot.slane %v240_v30, 4  ;;  %v248_v34 = vrot.slane %v247_v22, 4 }
  0x57   : > { %v214_v35 = vadd.f32 %v213_v27, %v212_v24  ;;  %v228_v36 = vadd.f32 %v227_v28, %v226_v26  ;;  %v235_v37 = vadd.f32 %v234_v29, %v233_v21  ;;  %v254_v38 = vsel %vm204_vm0, %v195_v18, 0.0 }
  0x58   : > { %v208_v39 = vrot.slane %v207_v31, 2  ;;  %v222_v40 = vrot.slane %v221_v32, 2  ;;  %v242_v41 = vadd.f32 %v241_v33, %v240_v30  ;;  %v249_v42 = vadd.f32 %v248_v34, %v247_v22 }
  0x59   : > { %v215_v43 = vrot.slane %v214_v35, 2  ;;  %v229_v44 = vrot.slane %v228_v36, 2  ;;  %v236_v45 = vrot.slane %v235_v37, 2  ;;  %v255_v46 = vrot.slane %v254_v38, 4 }
  0x5a   : > { %v209_v47 = vadd.f32 %v208_v39, %v207_v31  ;;  %v223_v48 = vadd.f32 %v222_v40, %v221_v32  ;;  %v243_v49 = vrot.slane %v242_v41, 2  ;;  %v250_v50 = vrot.slane %v249_v42, 2 }
  0x5b   : > { %v216_v51 = vadd.f32 %v215_v43, %v214_v35  ;;  %v230_v52 = vadd.f32 %v229_v44, %v228_v36  ;;  %v237_v53 = vadd.f32 %v236_v45, %v235_v37  ;;  %v256_v54 = vadd.f32 %v255_v46, %v254_v38 }
  0x5c   : > { %v210_v55 = vrot.slane %v209_v47, 1  ;;  %v224_v56 = vrot.slane %v223_v48, 1  ;;  %v244_v57 = vadd.f32 %v243_v49, %v242_v41  ;;  %v251_v58 = vadd.f32 %v250_v50, %v249_v42 }
  0x5d   : > { %v217_v59 = vrot.slane %v216_v51, 1  ;;  %v231_v60 = vrot.slane %v230_v52, 1  ;;  %v238_v61 = vrot.slane %v237_v53, 1  ;;  %v257_v62 = vrot.slane %v256_v54, 2 }
  0x5e   : > { %v211_v63 = vadd.f32 %v210_v55, %v209_v47  ;;  %v225_v0 = vadd.f32 %v224_v56, %v223_v48  ;;  %v245_v3 = vrot.slane %v244_v57, 1  ;;  %v252_v4 = vrot.slane %v251_v58, 1 }
  0x5f   : > { %v218_v5 = vadd.f32 %v217_v59, %v216_v51  ;;  %v232_v7 = vadd.f32 %v231_v60, %v230_v52  ;;  %v239_v8 = vadd.f32 %v238_v61, %v237_v53  ;;  %v258_v9 = vadd.f32 %v257_v62, %v256_v54 }
  0x60   : > { %v246_v11 = vadd.f32 %v245_v3, %v244_v57  ;;  %v253_v12 = vadd.f32 %v252_v4, %v251_v58  ;;  %v262_v13 = vmul.f32 0.5, %v211_v63  ;;  %v264_v14 = vmul.f32 0.5, %v225_v0 }
  0x61   : > { %v259_v15 = vrot.slane %v258_v9, 1  ;;  %v263_v16 = vmul.f32 0.5, %v218_v5  ;;  %v265_v17 = vmul.f32 0.5, %v232_v7  ;;  %v266_v18 = vmul.f32 0.5, %v239_v8 }
  0x62   : > { %v267_v19 = vmul.f32 0.5, %v246_v11  ;;  %v268_v21 = vmul.f32 0.5, %v253_v12 }
  0x63   : > { %v260_v20 = vadd.f32 %v259_v15, %v258_v9  ;;  %v278_v22 = vcombine.low %v262_v13, %v263_v16  ;;  %v279_v23 = vcombine.low %v264_v14, %v265_v17 }
  0x64   : > { %v295_v24 = vcombine.low %v266_v18, %v267_v19 }
  0x65   : > { %v269_v25 = vmul.f32 0.5, %v260_v20  ;;  %v286_v26 = vrot.slane %v278_v22, %v1107_v10  ;;  %v293_v27 = vrot.slane %v279_v23, %v1107_v10 }
  0x66   : > { %v303_v30 = vrot.slane %v295_v24, %v1107_v10 }
  0x67   : > { %v294_v28 = vcombine.low %v286_v26, %v293_v27  ;;  %v296_v29 = vcombine.low %v268_v21, %v269_v25 }
  0x69   : > { %v310_v31 = vrot.slane %v296_v29, %v1107_v10  ;;  %v314_v32 = vsub.f32 %v1092_v1, %v294_v28 }
  0x6b   : > { %v311_v33 = vcombine.low %v303_v30, %v310_v31  ;;  %v316_v34 = vmul.f32 %v314_v32, %v314_v32 }
  0x6d   : > { %v315_v35 = vsub.f32 %v1094_v2, %v311_v33  ;;  %v320_v36 = vcombine.high %v316_v34, %v316_v34  ;;  %v327_v37 = vrot.slane %v316_v34, %v1107_v10  ;;  %v941_v34 = vmov 1966171168  }
  0x6f   : > { %v317_v38 = vmul.f32 %v315_v35, %v315_v35  ;;  %v334_v39 = vrot.slane %v320_v36, %v1107_v10  ;;  %v335_v40 = vcombine.high %v327_v37, %v327_v37  ;;  %v362_v41 = vsel %vm204_vm0, %v327_v37, 0.0 }
  0x70   : > { %v363_v42 = vrot.slane %v362_v41, 4  ;;  %v488_v35 = vunpack.c.l.s4 %v941_v34 }
  0x71   : > { %v336_v43 = vcombine.high %v334_v39, %v334_v39  ;;  %v337_v44 = vcombine.high %v317_v38, %v317_v38  ;;  %v344_v45 = vrot.slane %v317_v38, %v1107_v10  ;;  %v369_v1 = vsel %vm204_vm0, %v335_v40, 0.0 }
  0x72   : > { %v364_v46 = vadd.f32 %v363_v42, %v362_v41  ;;  %v370_v47 = vrot.slane %v369_v1, 4  ;;  %v376_v2 = vsel %vm204_vm0, %v334_v39, 0.0  ;;  %v489_v42 = vunpack.c.0.s8 %v488_v35 }
  0x73   : > { %v351_v48 = vrot.slane %v337_v44, %v1107_v10  ;;  %v352_v49 = vcombine.high %v344_v45, %v344_v45  ;;  %v377_v50 = vrot.slane %v376_v2, 4  ;;  %v383_v51 = vsel %vm204_vm0, %v336_v43, 0.0 }
  0x74   : > { %v365_v52 = vrot.slane %v364_v46, 2  ;;  %v371_v53 = vadd.f32 %v370_v47, %v369_v1  ;;  %v384_v54 = vrot.slane %v383_v51, 4  ;;  %v390_v55 = vsel %vm204_vm0, %v344_v45, 0.0 }
  0x75   : > { %v353_v56 = vcombine.high %v351_v48, %v351_v48  ;;  %v378_v57 = vadd.f32 %v377_v50, %v376_v2  ;;  %v391_v58 = vrot.slane %v390_v55, 4  ;;  %v397_v59 = vsel %vm204_vm0, %v352_v49, 0.0 }
  0x76   : > { %v366_v60 = vadd.f32 %v365_v52, %v364_v46  ;;  %v372_v61 = vrot.slane %v371_v53, 2  ;;  %v385_v62 = vadd.f32 %v384_v54, %v383_v51  ;;  %v398_v63 = vrot.slane %v397_v59, 4 }
  0x77   : > { %v379_v0 = vrot.slane %v378_v57, 2  ;;  %v392_v10 = vadd.f32 %v391_v58, %v390_v55  ;;  %v404_v3 = vsel %vm204_vm0, %v351_v48, 0.0  ;;  %v411_v4 = vsel %vm204_vm0, %v353_v56, 0.0 }
  0x78   : > { %v367_v5 = vrot.slane %v366_v60, 1  ;;  %v373_v7 = vadd.f32 %v372_v61, %v371_v53  ;;  %v386_v8 = vrot.slane %v385_v62, 2  ;;  %v399_v9 = vadd.f32 %v398_v63, %v397_v59 }
  0x79   : > { %v380_v11 = vadd.f32 %v379_v0, %v378_v57  ;;  %v393_v12 = vrot.slane %v392_v10, 2  ;;  %v405_v13 = vrot.slane %v404_v3, 4  ;;  %v412_v14 = vrot.slane %v411_v4, 4 }
  0x7a   : > { %v368_v15 = vadd.f32 %v367_v5, %v366_v60  ;;  %v374_v16 = vrot.slane %v373_v7, 1  ;;  %v387_v17 = vadd.f32 %v386_v8, %v385_v62  ;;  %v400_v18 = vrot.slane %v399_v9, 2 }
  0x7b   : > { %v381_v19 = vrot.slane %v380_v11, 1  ;;  %v394_v20 = vadd.f32 %v393_v12, %v392_v10  ;;  %v406_v21 = vadd.f32 %v405_v13, %v404_v3  ;;  %v413_v22 = vadd.f32 %v412_v14, %v411_v4 }
  0x7c   : > { %v375_v23 = vadd.f32 %v374_v16, %v373_v7  ;;  %v388_v24 = vrot.slane %v387_v17, 1  ;;  %v401_v25 = vadd.f32 %v400_v18, %v399_v9  ;;  %800 = vrsqrt.f32 %v368_v15 }
  0x7d   : > { %v1141_v26 = vadd.f32 %v381_v19, %v380_v11  ;;  %v395_v27 = vrot.slane %v394_v20, 1  ;;  %v407_v28 = vrot.slane %v406_v21, 2  ;;  %v414_v29 = vrot.slane %v413_v22, 2 }
  0x7e   : > { %v1143_v30 = vadd.f32 %v388_v24, %v387_v17  ;;  %v402_v31 = vrot.slane %v401_v25, 1  ;;  %802 = vrsqrt.f32 %v375_v23  ;;  %vm421_vm1 = vcmp.eq.f32.partialorder %v368_v15, inf }
  0x7f   : > { %v408_v32 = vadd.f32 %v407_v28, %v406_v21  ;;  %v415_v33 = vadd.f32 %v414_v29, %v413_v22  ;;  %v1145_v36 = vadd.f32 %v395_v27, %v394_v20  ;;  %804 = vrsqrt.f32 %v1141_v26 }
  0x80   : > { %v1147_v37 = vadd.f32 %v402_v31, %v401_v25  ;;  %806 = vrsqrt.f32 %v1143_v30  ;;  %v1160_v45 = vsub.s32 %v489_v42, %v1100_v6  ;;  %vm423_vm2 = vcmp.eq.f32.partialorder %v368_v15, 0.0 }
  0x81   : > { %v409_v38 = vrot.slane %v408_v32, 1  ;;  %v416_v39 = vrot.slane %v415_v33, 1  ;;  %808 = vrsqrt.f32 %v1145_v36  ;;  %v424_v1 = vand.u32 2147483648, %v368_v15 }
  0x82   : > { %810 = vrsqrt.f32 %v1147_v37  ;;  %vm428_vm3 = vcmp.eq.f32.partialorder %v375_v23, inf  ;;  %vm430_vm4 = vcmp.eq.f32.partialorder %v375_v23, 0.0  ;;  %v431_v47 = vand.u32 2147483648, %v375_v23 }
  0x83   : > { %v1151_v40 = vadd.f32 %v409_v38, %v408_v32  ;;  %v1153_v41 = vadd.f32 %v416_v39, %v415_v33  ;;  %vm435_vm5 = vcmp.eq.f32.partialorder %v1141_v26, inf  ;;  %vm437_vm6 = vcmp.eq.f32.partialorder %v1141_v26, 0.0  ;;  %v418_v32 = vld [vmem:[#allocation2] sm:$0xff] }
  0x84   : > { %v438_v48 = vand.u32 2147483648, %v1141_v26  ;;  %vm442_vm7 = vcmp.eq.f32.partialorder %v1143_v30, inf  ;;  %vm444_vm8 = vcmp.eq.f32.partialorder %v1143_v30, 0.0  ;;  %v445_v6 = vand.u32 2147483648, %v1143_v30 }
  0x85   : > { %812 = vrsqrt.f32 %v1151_v40  ;;  %vm449_vm9 = vcmp.eq.f32.partialorder %v1145_v36, inf  ;;  %vm451_vm10 = vcmp.eq.f32.partialorder %v1145_v36, 0.0  ;;  %v452_v51 = vand.u32 2147483648, %v1145_v36 }
  0x86   : > { %v801_v43 = vpop.eup %800  ;;  %814 = vrsqrt.f32 %v1153_v41  ;;  %vm456_vm11 = vcmp.eq.f32.partialorder %v1147_v37, inf  ;;  %vm458_vm12 = vcmp.eq.f32.partialorder %v1147_v37, 0.0  ;;  %v459_v57 = vand.u32 2147483648, %v1147_v37 }
  0x87   : > { %v420_v44 = vmul.f32 %v801_v43, %v368_v15  ;;  %vm463_vm13 = vcmp.eq.f32.partialorder %v1151_v40, inf  ;;  %vm465_vm14 = vcmp.eq.f32.partialorder %v1151_v40, 0.0  ;;  %v466_v61 = vand.u32 2147483648, %v1151_v40 }
  0x88   : > { %v803_v2 = vpop.eup %802  ;;  %vm470_vm15 = vcmp.eq.f32.partialorder %v1153_v41, inf  ;;  %vm472_vm0 = vcmp.eq.f32.partialorder %v1153_v41, 0.0  ;;  %v473_v12 = vand.u32 2147483648, %v1153_v41 }
  0x89   : > { %v422_v46 = vsel %vm421_vm1, %v368_v15, %v420_v44  ;;  %v805_v49 = vpop.eup %804  ;;  %v427_v50 = vmul.f32 %v803_v2, %v375_v23 }
  0x8a   : > { %v807_v52 = vpop.eup %806  ;;  %v425_v53 = vsel %vm423_vm2, %v424_v1, %v422_v46  ;;  %v434_v54 = vmul.f32 %v805_v49, %v1141_v26 }
  0x8b   : > { %v429_v55 = vsel %vm428_vm3, %v375_v23, %v427_v50  ;;  %v441_v56 = vmul.f32 %v807_v52, %v1143_v30  ;;  %v809_v58 = vpop.eup %808 }
  0x8c   : > { %v432_v59 = vsel %vm430_vm4, %v431_v47, %v429_v55  ;;  %v436_v60 = vsel %vm435_vm5, %v1141_v26, %v434_v54  ;;  %v811_v62 = vpop.eup %810  ;;  %v448_v10 = vmul.f32 %v809_v58, %v1145_v36 }
  0x8d   : > { %v439_v63 = vsel %vm437_vm6, %v438_v48, %v436_v60  ;;  %v443_v0 = vsel %vm442_vm7, %v1143_v30, %v441_v56  ;;  %v483_v3 = vcombine.low %v425_v53, %v432_v59  ;;  %v455_v7 = vmul.f32 %v811_v62, %v1147_v37 }
  0x8e   : > { %v446_v5 = vsel %vm444_vm8, %v445_v6, %v443_v0  ;;  %v450_v9 = vsel %vm449_vm9, %v1145_v36, %v448_v10 }
  0x8f   : > { %v813_v4 = vpop.eup %812  ;;  %v484_v13 = vcombine.low %v439_v63, %v446_v5  ;;  %v453_v14 = vsel %vm451_vm10, %v452_v51, %v450_v9  ;;  %v457_v15 = vsel %vm456_vm11, %v1147_v37, %v455_v7  ;;  %v493_v17 = vrot.slane %v483_v3, %v1160_v45 }
  0x90   : > { %v815_v8 = vpop.eup %814  ;;  %v462_v11 = vmul.f32 %v813_v4, %v1151_v40  ;;  %v460_v18 = vsel %vm458_vm12, %v459_v57, %v457_v15 }
  0x91   : > { %v469_v16 = vmul.f32 %v815_v8, %v1153_v41  ;;  %v500_v20 = vrot.slane %v484_v13, %v1160_v45  ;;  %v485_v23 = vcombine.low %v453_v14, %v460_v18 }
  0x92   : > { %v464_v19 = vsel %vm463_vm13, %v1151_v40, %v462_v11 }
  0x93   : > { %v467_v21 = vsel %vm465_vm14, %v466_v61, %v464_v19  ;;  %v471_v22 = vsel %vm470_vm15, %v1153_v41, %v469_v16  ;;  %v507_v26 = vrot.slane %v485_v23, %v1160_v45  ;;  %v515_v27 = vcombine.low %v493_v17, %v500_v20 }
  0x94   : > { %v474_v24 = vsel %vm472_vm0, %v473_v12, %v471_v22 }
  0x95   : > { %v486_v25 = vcombine.low %v467_v21, %v474_v24  ;;  %v523_v30 = vrot.slane %v515_v27, %v1160_v45 }
  0x97   : > { %v514_v28 = vrot.slane %v486_v25, %v1160_v45 }
  0x99   : > { %v516_v29 = vcombine.low %v507_v26, %v514_v28 }
  0x9b   : > { %v530_v31 = vrot.slane %v516_v29, %v1160_v45 }
  0x9d   : > { %v531_v33 = vcombine.low %v523_v30, %v530_v31 }
  0x9f   : > { %v533_v34 = vadd.f32 %v531_v33, %v418_v32 }
  0xa1   : > { %534 = vst [vmem:[#allocation2] sm:$0xff] %v533_v34 }
  0xa2 PF: > { %p712_p8 = scmp.ne.s32.totalorder %s987_s13, 1 }
  0xa3   : > { %v541_v35 = vlaneseq (!%p712_p8)  ;;  %vm581_vm1 = vcmask (!%p712_p8), 1040384  }
  0xa4   : > { %538 = sbr.rel (%p712_p8) target bundleno = 394 (0x18a), region = 40 }
  0xa5   : > { %v542_v36 = vshrl.u32 (!%p712_p8), %v541_v35, 7 }
  0xa7   : > { %v543_v38 = vsub.s32 (!%p712_p8), 0, %v542_v36  ;;  %v547_v39 = vsub.s32 (!%p712_p8), 1, %v542_v36  ;;  %v551_v40 = vsub.s32 (!%p712_p8), 2, %v542_v36  ;;  %v555_v41 = vsub.s32 (!%p712_p8), 3, %v542_v36 }
  0xa8   : > { %v539_v37 = vld [vmem:[#allocation2] sm:$0xff] (!%p712_p8)  ;;  %v559_v42 = vsub.s32 (!%p712_p8), 4, %v542_v36  ;;  %v563_v43 = vsub.s32 (!%p712_p8), 5, %v542_v36  ;;  %v567_v47 = vsub.s32 (!%p712_p8), 6, %v542_v36  ;;  %v571_v52 = vsub.s32 (!%p712_p8), 7, %v542_v36 }
  0xa9   : > { %v544_v44 = vrot.slane (!%p712_p8), %v539_v37, %v543_v38  ;;  %v548_v45 = vrot.slane (!%p712_p8), %v539_v37, %v547_v39  ;;  %v552_v1 = vrot.slane (!%p712_p8), %v539_v37, %v551_v40  ;;  %v556_v46 = vrot.slane (!%p712_p8), %v539_v37, %v555_v41 }
  0xaa   : > { %v560_v2 = vrot.slane (!%p712_p8), %v539_v37, %v559_v42  ;;  %v564_v51 = vrot.slane (!%p712_p8), %v539_v37, %v563_v43  ;;  %v568_v55 = vrot.slane (!%p712_p8), %v539_v37, %v567_v47  ;;  %v572_v58 = vrot.slane (!%p712_p8), %v539_v37, %v571_v52 }
  0xab   : > { %v582_v48 = vsel %vm581_vm1, %v544_v44, 0.0  ;;  %v583_v6 = vsel %vm581_vm1, %v548_v45, 0.0  ;;  %v585_v49 = vsel %vm581_vm1, %v552_v1, 0.0  ;;  %v587_v53 = vsel %vm581_vm1, %v556_v46, 0.0 }
  0xac   : > { %v584_v50 = vadd.f32 %v583_v6, %v582_v48  ;;  %v589_v56 = vsel %vm581_vm1, %v560_v2, 0.0  ;;  %v591_v59 = vsel %vm581_vm1, %v564_v51, 0.0  ;;  %v593_v61 = vsel %vm581_vm1, %v568_v55, 0.0 }
  0xad   : > { %v595_v63 = vsel %vm581_vm1, %v572_v58, 0.0 }
  0xae   : > { %v586_v54 = vadd.f32 %v585_v49, %v584_v50 }
  0xb0   : > { %v588_v57 = vadd.f32 %v587_v53, %v586_v54 }
  0xb2   : > { %v590_v60 = vadd.f32 %v589_v56, %v588_v57 }
  0xb4   : > { %v592_v62 = vadd.f32 %v591_v59, %v590_v60 }
  0xb6   : > { %v594_v0 = vadd.f32 %v593_v61, %v592_v62 }
  0xb8   : > { %v596_v10 = vadd.f32 %v595_v63, %v594_v0 }
  0xba   : > { %597 = vadd.xlane.f32.xlu0 %v596_v10 }
 0x147   : > { %v598_v3 = vpop.xlane.xlu0 %597 }
 0x148   : > { %v599_v4 = vrot.slane %v598_v3, 4 }
 0x14a   : > { %v600_v5 = vadd.f32 %v599_v4, %v598_v3 }
 0x14c   : > { %v601_v7 = vrot.slane %v600_v5, 2 }
 0x14e   : > { %v602_v8 = vadd.f32 %v601_v7, %v600_v5 }
 0x150   : > { %v603_v9 = vrot.slane %v602_v8, 1 }
 0x152   : > { %v604_v11 = vadd.f32 %v603_v9, %v602_v8 }
 0x154   : > { %724 = vpush %v604_v11 }
 0x185   : > { %s725_s23 = spop %724 }
 0x186   : > { %v606_v12 = vstv %s725_s23 }
 0x187   : > { %v607_v13 = vmul.f32 0.0009765625, %v606_v12 }
 0x189   : > { %608 = vst [vmem:[%s1088_s9] sm:$0xff] %v607_v13  ;;  %609 = vst [vmem:[%s1088_s9 + $0x8] sm:$0xff] %v607_v13 }
 0x18a PF: > { %s1236_s16 = scalar_lea.sflag [#allocation5], %s136_s14  ;;  %p1310_p4 = scmp.ne.s32.totalorder %s1305_s26, 0 }
 0x18b   : > { %s714_s19 = sshll.u32 (%p1310_p4), %s987_s13, 3 }
 0x18c   : > { %617 = sbr.rel (!%p1310_p4) target bundleno = 430 (0x1ae), region = 44  ;;  %s619_s20 = ssub.s32 (%p1310_p4), 10, %s714_s19 }
 0x18d   : > { %p620_p12 = scmp.lt.s32.totalorder (%p1310_p4), %s619_s20, 8 }
 0x193   : > { %s1321_s20 = smov (!%p620_p12, %s619_s20), 8 }
 0x194   : > { %s1241_s21 = sshll.u32 %s1321_s20, 5 }
 0x195   : > { %s624_s24 = ssub.s32 256, %s1241_s21 }
 0x196   : > { %625 = vsyncadd %s1236_s16, %s624_s24  ;;  %p716_p2 = scmp.ne.s32.totalorder %s1241_s21, 0  ;;  %s723_s28 = sshll.u32 %s987_s13, 8 }
 0x197   : > { %s1250_s30 = scalar_lea.hbm %s1302_s1, %s723_s28  ;;  %s631_s2 = sshll.u32 %s1088_s9, 4  ;;  %s632_s2 = int_to_ptr.vmem [resolvable:$true] %s631_s2 }
 0x198   : > { %s846_s3 = scalar_lea.vmem %s632_s2, %s1241_s21  ;;  %s942_s5 = smov [#allocation6]  }
 0x199   : > { %p847_p9 = scmp.ne.s32.totalorder %s632_s2, %s846_s3  ;;  %s850_s17 = sshll.u32 %s942_s5, 4  ;;  %s851_s17 = int_to_ptr.vmem [resolvable:$false] %s850_s17 }
 0x19a   : > { %s852_s18 = scalar_lea.vmem %s851_s17, 512  ;;  %p853_p13 = scmp.lt.s32.totalorder %s632_s2, %s851_s17 }
 0x19b   : > { %p848_p11 = pnand %p847_p9, %p716_p2  ;;  %p854_p0 = scmp.lt.s32.totalorder %s852_s18, %s846_s3 }
 0x19d   : > { %p849_p6 = pneg %p848_p11  ;;  %p855_p5 = por %p854_p0, %p853_p13 }
 0x19f   : > { %p856_p7 = pnand %p855_p5, %p849_p6 }
 0x1a1   : > { %859 = shalt.err (!%p856_p7)
}
 0x1a2   : > { %s860_s13 = scalar_lea.hbm %s1250_s30, %s1241_s21  ;;  %s864_s9 = scalar_lea.hbm %s1302_s1, 320 }
 0x1a3   : > { %p861_p10 = scmp.ne.s32.totalorder %s1250_s30, %s860_s13  ;;  %p865_p8 = scmp.lt.u32.totalorder %s1250_s30, %s1302_s1 }
 0x1a4   : > { %p866_p4 = scmp.lt.u32.totalorder %s864_s9, %s860_s13  ;;  %p868_p9 = scmp.lt.u32.totalorder %s860_s13, %s1250_s30 }
 0x1a5   : > { %p862_p1 = pnand %p861_p10, %p716_p2 }
 0x1a6   : > { %p867_p12 = por %p866_p4, %p865_p8 }
 0x1a7   : > { %p863_p3 = pneg %p862_p1 }
 0x1a8   : > { %p869_p11 = por %p868_p9, %p867_p12 }
 0x1aa   : > { %p870_p6 = pnand %p869_p11, %p863_p3 }
 0x1ac   : > { %873 = shalt.err (!%p870_p6)
}
 0x1ad   : > { %634 = dma.vmem_to_hbm [thread:$0]  (%p716_p2), %s632_s2, %s1241_s21, %s1250_s30, %s1236_s16  }
 0x1ae PF: > { %s643_s20 = sand.u32 1, %s912_s6   ;;  %p1311_p13 = scmp.ne.s32.totalorder %s1306_s27, 0 }
 0x1af   : > { %p1312_p0 = scmp.ge.s32.totalorder %s936_s12, 2  ;;  %s644_s24 = scalar_lea.sflag [#allocation5], %s643_s20 }
 0x1b1   : > { %p734_p5 = pnand %p1312_p0, %p1311_p13 }
 0x1b3   : > { %907 = dma.done.wait (!%p734_p5), %s644_s24, 256  }
 0x1b4   : > { %909 = vsyncadd (!%p734_p5), %s644_s24, 4294967040  ;;  %p14_p2 = scmp.ge.s32.totalorder %s991_s15, 4   ;;  %s1313_s6 = smov %s916_s7 }
 0x1b5   : > { %s1314_s7 = smov %s920_s8  ;;  %s1315_s8 = smov %s1020_s25 }
 0x1b6   : > { %s1316_s9 = smov %s928_s10  ;;  %s1317_s10 = smov %s932_s11 }
 0x1b7   : > { %s1318_s11 = smov %s1010_s22  ;;  %s1319_s12 = smov %s991_s15 }
 0x1b8   :  { %16 = sbr.rel (!%p14_p2) target bundleno = 7 (0x7), region = 81 }
 0x1bf   :  { %649 = vsyncpa [#allocation4], 1 }
 0x1c0   :  { %651 = vsyncpa [#allocation4 + $0x1], 1 }
 0x1c1   :  { %652 = vsyncpa [#allocation5], 1 }
 0x1c2   :  { %654 = vsyncpa [#allocation5 + $0x1], 1 }

</bundles_post_ra>
